<compile_context>
chip_gen: v7x
topology: tpu7x:2x2x1
jax: 0.10.0
libtpu: 0.0.40
codegen_flags: <defaults>
</compile_context>

<pallas_src>
import functools
import math

import jax
import jax.numpy as jnp
import numpy as np
from jax.experimental import pallas as pl
from jax.experimental.pallas import tpu as pltpu


def _global_graph_kernel(x_ref, mask_ref, w_ref, b_ref, out_ref, *, head_dim):
    # x_ref:    (Bt, S, H)
    # mask_ref: (Bt, S, S)
    # w_ref:    (1, H, 3d)   per-head fused [Wq*scale | Wk | Wv]
    # b_ref:    (1, 1, 3d)   per-head fused [bq*scale | 0   | bv]
    # out_ref:  (Bt, 1, S, d)
    d = head_dim
    Bt, S, H = x_ref.shape

    # One fused QKV projection for this head (single wide MXU pass, M = Bt*S).
    x2 = x_ref[...].reshape(Bt * S, H)
    qkv = jnp.dot(x2, w_ref[0], preferred_element_type=jnp.float32) + b_ref[0]
    qkv = qkv.reshape(Bt, S, 3 * d)

    q = qkv[:, :, 0:d]          # 1/sqrt(d) already folded into the weights/bias
    k = qkv[:, :, d:2 * d]      # key has no bias (zeros packed in b_ref), per reference
    v = qkv[:, :, 2 * d:3 * d]

    # Extended attention mask: 1 -> 0, 0 -> -10000.0
    ext_mask = (1.0 - mask_ref[...]) * jnp.float32(-10000.0)          # (Bt, S, S)

    # Batched contraction on the last dim: no explicit K transpose materialized.
    scores = jnp.einsum("bqd,bkd->bqk", q, k,
                        preferred_element_type=jnp.float32) + ext_mask  # (Bt, S, S)

    m = jnp.max(scores, axis=-1, keepdims=True)
    p = jnp.exp(scores - m)
    l = jnp.sum(p, axis=-1, keepdims=True)
    probs = p * pl.reciprocal(l, approx=False)                        # exact, EUP/divide path

    ctx = jnp.einsum("bqk,bkd->bqd", probs, v,
                     preferred_element_type=jnp.float32)              # (Bt, S, d)

    # Single full-block (lane-dense) store for this (batch block, head).
    out_ref[...] = ctx.reshape(Bt, 1, S, d)


def _pick_batch_block(B, S, target_rows=256):
    """Largest divisor of B such that Bt*S stays within a reasonable MXU/VMEM row budget."""
    best = 1
    for bt in range(1, B + 1):
        if B % bt == 0 and bt * S <= max(target_rows, S):
            best = bt
    return best


def global_graph_forward(hidden_states, attention_mask, params, *, num_heads):
    """Pallas implementation of GlobalGraph.forward (return_scores=False)."""
    B, S, H = hidden_states.shape
    A = params["wq"].shape[1]                 # all_head_size
    d = A // num_heads
    scale = 1.0 / math.sqrt(d)

    # --- pre-pack per-head fused QKV weights / bias on the host side -------------------
    def per_head_w(w):                        # (H, A) -> (nh, H, d)
        return w.reshape(H, num_heads, d).transpose(1, 0, 2)

    def per_head_b(b):                        # (1, A) -> (nh, 1, d)
        return b.reshape(num_heads, d)[:, None, :]

    w_heads = jnp.concatenate(
        [per_head_w(params["wq"] * scale),    # fold 1/sqrt(d) into Wq
         per_head_w(params["wk"]),
         per_head_w(params["wv"])],
        axis=-1).astype(jnp.float32)          # (nh, H, 3d)

    b_heads = jnp.concatenate(
        [per_head_b(params["bq"] * scale),    # fold 1/sqrt(d) into bq
         jnp.zeros((num_heads, 1, d), jnp.float32),   # key: no bias (matches reference)
         per_head_b(params["bv"])],
        axis=-1).astype(jnp.float32)          # (nh, 1, 3d)

    Bt = _pick_batch_block(B, S)
    kernel = functools.partial(_global_graph_kernel, head_dim=d)

    grid_spec = pltpu.PrefetchScalarGridSpec(
        num_scalar_prefetch=0,
        grid=(B // Bt, num_heads),            # heads innermost: x/mask blocks not re-fetched per head
        in_specs=[
            pl.BlockSpec((Bt, S, H), lambda b, h: (b, 0, 0)),      # hidden_states
            pl.BlockSpec((Bt, S, S), lambda b, h: (b, 0, 0)),      # attention_mask
            pl.BlockSpec((1, H, 3 * d), lambda b, h: (h, 0, 0)),   # fused per-head weights
            pl.BlockSpec((1, 1, 3 * d), lambda b, h: (h, 0, 0)),   # fused per-head bias
        ],
        out_specs=pl.BlockSpec((Bt, 1, S, d), lambda b, h: (b, h, 0, 0)),
    )

    out = pl.pallas_call(
        kernel,
        out_shape=jax.ShapeDtypeStruct((B, num_heads, S, d), jnp.float32),
        grid_spec=grid_spec,
        compiler_params=pltpu.CompilerParams(
            dimension_semantics=("parallel", "parallel")),
    )(hidden_states, attention_mask, w_heads, b_heads)

    # (B, nh, S, d) -> (B, S, nh*d) == permute(0,2,1,3).reshape(..., all_head_size)
    return out.transpose(0, 2, 1, 3).reshape(B, S, A)


def global_graph_reference(hidden_states, attention_mask, params, *, num_heads):
    """Pure-JAX reference mirroring the PyTorch forward, for verification."""
    B, S, H = hidden_states.shape
    A = params["wq"].shape[1]
    d = A // num_heads

    q = hidden_states @ params["wq"] + params["bq"]            # (B, S, A)
    k = hidden_states @ params["wk"]                           # (B, S, A)  no bias
    v = hidden_states @ params["wv"] + params["bv"]            # (B, S, A)

    def split(x):
        return x.reshape(B, S, num_heads, d).transpose(0, 2, 1, 3)  # (B, nh, S, d)

    qh, kh, vh = split(q), split(k), split(v)
    scores = jnp.einsum("bhqd,bhkd->bhqk", qh / math.sqrt(d), kh)
    ext = ((1.0 - attention_mask) * -10000.0)[:, None, :, :]
    scores = scores + ext
    probs = jax.nn.softmax(scores, axis=-1)
    ctx = jnp.einsum("bhqk,bhkd->bhqd", probs, vh)
    return ctx.transpose(0, 2, 1, 3).reshape(B, S, A)


if __name__ == "__main__":
    B, S, H = 2, 8, 32
    NUM_HEADS = 2
    ALL_HEAD = H  # attention_head_size = hidden // num_heads -> all_head_size == hidden

    key = jax.random.PRNGKey(0)
    kx, km, k1, k2, k3, k4, k5 = jax.random.split(key, 7)

    hidden_states = jax.random.normal(kx, (B, S, H), dtype=jnp.float32)
    # attention mask: 1 = attend, 0 = don't; non-trivial but at least one valid key per row.
    attention_mask = (jax.random.uniform(km, (B, S, S)) > 0.3).astype(jnp.float32)
    attention_mask = attention_mask.at[:, :, 0].set(1.0)

    scale = 1.0 / math.sqrt(H)
    params = {
        "wq": jax.random.normal(k1, (H, ALL_HEAD), dtype=jnp.float32) * scale,
        "bq": jax.random.normal(k2, (1, ALL_HEAD), dtype=jnp.float32) * 0.1,
        "wk": jax.random.normal(k3, (H, ALL_HEAD), dtype=jnp.float32) * scale,
        "wv": jax.random.normal(k4, (H, ALL_HEAD), dtype=jnp.float32) * scale,
        "bv": jax.random.normal(k5, (1, ALL_HEAD), dtype=jnp.float32) * 0.1,
    }

    out = global_graph_forward(hidden_states, attention_mask, params, num_heads=NUM_HEADS)
    out = jax.block_until_ready(out)

    ref = global_graph_reference(hidden_states, attention_mask, params, num_heads=NUM_HEADS)
    np.testing.assert_allclose(np.asarray(out), np.asarray(ref), rtol=1e-5, atol=1e-5)

    print("KERNEL_OK")
</pallas_src>

<mosaic_0001>
module attributes {stable_mosaic.version = 11 : i64} {
  func.func @_global_graph_kernel(%arg0: i32, %arg1: i32, %arg2: memref<2x8x32xf32, #tpu.memory_space<vmem>>, %arg3: memref<2x8x8xf32, #tpu.memory_space<vmem>>, %arg4: memref<1x32x48xf32, #tpu.memory_space<vmem>>, %arg5: memref<1x1x48xf32, #tpu.memory_space<vmem>>, %arg6: memref<2x1x8x16xf32, #tpu.memory_space<vmem>>) attributes {dimension_semantics = [#tpu.dimension_semantics<parallel>, #tpu.dimension_semantics<parallel>], iteration_bounds = array<i64: 1, 2>, scalar_prefetch = 0 : i64, scratch_operands = 0 : i64, tpu.core_type = #tpu.core_type<tc>, window_params = [{transform_indices = @transform_0, window_bounds = array<i64: 2, 8, 32>}, {transform_indices = @transform_1, window_bounds = array<i64: 2, 8, 8>}, {transform_indices = @transform_2, window_bounds = array<i64: 1, 32, 48>}, {transform_indices = @transform_3, window_bounds = array<i64: 1, 1, 48>}, {transform_indices = @transform_4, window_bounds = array<i64: 2, 1, 8, 16>}]} {
    %c0 = arith.constant 0 : index
    %c0_0 = arith.constant 0 : index
    %c0_1 = arith.constant 0 : index
    %0 = vector.load %arg2[%c0, %c0_0, %c0_1] : memref<2x8x32xf32, #tpu.memory_space<vmem>>, vector<2x8x32xf32>
    %1 = vector.shape_cast %0 : vector<2x8x32xf32> to vector<16x32xf32>
    %c0_2 = arith.constant 0 : index
    %c0_3 = arith.constant 0 : index
    %c0_4 = arith.constant 0 : index
    %2 = vector.load %arg4[%c0_2, %c0_3, %c0_4] : memref<1x32x48xf32, #tpu.memory_space<vmem>>, vector<1x32x48xf32>
    %3 = vector.shape_cast %2 : vector<1x32x48xf32> to vector<32x48xf32>
    %cst = arith.constant dense<0.000000e+00> : vector<16x48xf32>
    %4 = tpu.matmul %1, %3, %cst {dimension_numbers = #tpu.dot_dimension_numbers<[1], [0], [0], [1], [0, 0, 1, 1], [], []>} : vector<16x32xf32>, vector<32x48xf32>, vector<16x48xf32> -> vector<16x48xf32>
    %c0_5 = arith.constant 0 : index
    %c0_6 = arith.constant 0 : index
    %c0_7 = arith.constant 0 : index
    %5 = vector.load %arg5[%c0_5, %c0_6, %c0_7] : memref<1x1x48xf32, #tpu.memory_space<vmem>>, vector<1x1x48xf32>
    %6 = vector.shape_cast %5 : vector<1x1x48xf32> to vector<1x48xf32>
    %7 = vector.broadcast %6 : vector<1x48xf32> to vector<16x48xf32>
    %8 = arith.addf %4, %7 : vector<16x48xf32>
    %9 = vector.shape_cast %8 : vector<16x48xf32> to vector<2x8x48xf32>
    %10 = vector.extract_strided_slice %9 {offsets = [0, 0, 0], sizes = [2, 8, 16], strides = [1, 1, 1]} : vector<2x8x48xf32> to vector<2x8x16xf32>
    %11 = vector.extract_strided_slice %9 {offsets = [0, 0, 16], sizes = [2, 8, 16], strides = [1, 1, 1]} : vector<2x8x48xf32> to vector<2x8x16xf32>
    %12 = vector.extract_strided_slice %9 {offsets = [0, 0, 32], sizes = [2, 8, 16], strides = [1, 1, 1]} : vector<2x8x48xf32> to vector<2x8x16xf32>
    %c0_8 = arith.constant 0 : index
    %c0_9 = arith.constant 0 : index
    %c0_10 = arith.constant 0 : index
    %13 = vector.load %arg3[%c0_8, %c0_9, %c0_10] : memref<2x8x8xf32, #tpu.memory_space<vmem>>, vector<2x8x8xf32>
    %cst_11 = arith.constant 1.000000e+00 : f32
    %14 = vector.broadcast %cst_11 : f32 to vector<2x8x8xf32>
    %15 = arith.subf %14, %13 : vector<2x8x8xf32>
    %cst_12 = arith.constant -1.000000e+04 : f32
    %16 = vector.broadcast %cst_12 : f32 to vector<2x8x8xf32>
    %17 = arith.mulf %15, %16 : vector<2x8x8xf32>
    "tpu.trace_start"() <{level = 10 : i32, message = "bqd,bkd->bqk"}> : () -> ()
    %cst_13 = arith.constant dense<0.000000e+00> : vector<2x8x8xf32>
    %18 = tpu.matmul %10, %11, %cst_13 {dimension_numbers = #tpu.dot_dimension_numbers<[2], [2], [1], [1], [0, 0, 0, 1, 1, 1], [0], [0]>} : vector<2x8x16xf32>, vector<2x8x16xf32>, vector<2x8x8xf32> -> vector<2x8x8xf32>
    "tpu.trace_stop"() : () -> ()
    %19 = arith.addf %18, %17 : vector<2x8x8xf32>
    %cst_14 = arith.constant dense<0xFF800000> : vector<2x8xf32>
    %20 = vector.multi_reduction <maximumf>, %19, %cst_14 [2] : vector<2x8x8xf32> to vector<2x8xf32>
    %21 = vector.shape_cast %20 : vector<2x8xf32> to vector<2x8x1xf32>
    %22 = vector.broadcast %21 : vector<2x8x1xf32> to vector<2x8x8xf32>
    %23 = arith.subf %19, %22 : vector<2x8x8xf32>
    %24 = math.exp %23 : vector<2x8x8xf32>
    %cst_15 = arith.constant dense<0.000000e+00> : vector<2x8xf32>
    %25 = vector.multi_reduction <add>, %24, %cst_15 [2] : vector<2x8x8xf32> to vector<2x8xf32>
    %26 = vector.shape_cast %25 : vector<2x8xf32> to vector<2x8x1xf32>
    %27 = tpu.reciprocal %26 : vector<2x8x1xf32> -> vector<2x8x1xf32>
    %28 = vector.broadcast %27 : vector<2x8x1xf32> to vector<2x8x8xf32>
    %29 = arith.mulf %24, %28 : vector<2x8x8xf32>
    "tpu.trace_start"() <{level = 10 : i32, message = "bqk,bkd->bqd"}> : () -> ()
    %cst_16 = arith.constant dense<0.000000e+00> : vector<2x8x16xf32>
    %30 = tpu.matmul %29, %12, %cst_16 {dimension_numbers = #tpu.dot_dimension_numbers<[2], [1], [1], [2], [0, 0, 0, 1, 1, 2], [0], [0]>} : vector<2x8x8xf32>, vector<2x8x16xf32>, vector<2x8x16xf32> -> vector<2x8x16xf32>
    "tpu.trace_stop"() : () -> ()
    %31 = vector.shape_cast %30 : vector<2x8x16xf32> to vector<2x1x8x16xf32>
    %c0_17 = arith.constant 0 : index
    %c0_18 = arith.constant 0 : index
    %c0_19 = arith.constant 0 : index
    %c0_20 = arith.constant 0 : index
    %32 = vector.load %arg6[%c0_17, %c0_18, %c0_19, %c0_20] : memref<2x1x8x16xf32, #tpu.memory_space<vmem>>, vector<2x1x8x16xf32>
    tpu.vector_store %arg6[%c0_17, %c0_18, %c0_19, %c0_20], %31 {strides = array<i32>} : memref<2x1x8x16xf32, #tpu.memory_space<vmem>>, vector<2x1x8x16xf32>,
    return
  }
  func.func @transform_0(%arg0: i32, %arg1: i32) -> (i32, i32, i32) {
    %c0_i32 = arith.constant 0 : i32
    %c0_i32_0 = arith.constant 0 : i32
    %c0_i32_1 = arith.constant 0 : i32
    return %arg0, %c0_i32, %c0_i32_0 : i32, i32, i32
  }
  func.func @transform_1(%arg0: i32, %arg1: i32) -> (i32, i32, i32) {
    %c0_i32 = arith.constant 0 : i32
    %c0_i32_0 = arith.constant 0 : i32
    %c0_i32_1 = arith.constant 0 : i32
    return %arg0, %c0_i32, %c0_i32_0 : i32, i32, i32
  }
  func.func @transform_2(%arg0: i32, %arg1: i32) -> (i32, i32, i32) {
    %c0_i32 = arith.constant 0 : i32
    %c0_i32_0 = arith.constant 0 : i32
    %c0_i32_1 = arith.constant 0 : i32
    return %arg1, %c0_i32, %c0_i32_0 : i32, i32, i32
  }
  func.func @transform_3(%arg0: i32, %arg1: i32) -> (i32, i32, i32) {
    %c0_i32 = arith.constant 0 : i32
    %c0_i32_0 = arith.constant 0 : i32
    %c0_i32_1 = arith.constant 0 : i32
    return %arg1, %c0_i32, %c0_i32_0 : i32, i32, i32
  }
  func.func @transform_4(%arg0: i32, %arg1: i32) -> (i32, i32, i32, i32) {
    %c0_i32 = arith.constant 0 : i32
    %c0_i32_0 = arith.constant 0 : i32
    %c0_i32_1 = arith.constant 0 : i32
    return %arg0, %arg1, %c0_i32, %c0_i32_0 : i32, i32, i32, i32
  }
}

</mosaic_0001>

<bundles_post_ra>
// kernel: tpu_custom_call.1
= control target key start
LH: loop header
LB: loop body
LE: loop exit
PB: predicated region body
PF: predicated region fallthrough
CT: control target
= control target key end

     0   :  { %9 = vsyncpa [#allocation3], 0  ;;  %s1540_s0 = inlined_call_operand.hbm [shape: f32[2,8,32], index: 0, kind: input, shape index: {}]   ;;  %s1541_s1 = inlined_call_operand.hbm [shape: f32[2,8,8], index: 1, kind: input, shape index: {}]   ;;  %s1542_s2 = inlined_call_operand.hbm [shape: f32[2,32,48], index: 2, kind: input, shape index: {}]   ;;  %s1543_s3 = inlined_call_operand.vmem [shape: f32[2,1,48], index: 3, kind: input, shape index: {}]   ;;  %s1544_s4 = inlined_call_operand.hbm [shape: f32[2,2,8,16], index: 4, kind: output, shape index: {}]  }
   0x1   :  { %10 = vsyncpa [#allocation6], 0 }
   0x2   :  { %11 = vsyncpa [#allocation4], 0 }
   0x3   :  { %13 = vsyncpa [#allocation4 + $0x1], 0  ;;  %s1251_s15 = smov 0   ;;  %s1253_s16 = smov 0  }
   0x4   :  { %s1255_s17 = smov 0   ;;  %s1257_s18 = smov 0  }
   0x5   :  { %s1259_s19 = smov 0   ;;  %s1261_s20 = smov 0  }
   0x6 LB: > { %s1282_s21 = sadd.s32 4294967295, %s1211_s20   ;;  %s855_s22 = sadd.s32 4294967294, %s1211_s20   ;;  %s1211_s20 = sphi %s1261_s20, %s19_s20   ;;  %s1207_s19 = sphi %s1259_s19, %s1571_s19   ;;  %s1203_s18 = sphi %s1257_s18, %s1570_s18   ;;  %s1199_s17 = sphi %s1255_s17, %s1569_s17   ;;  %s1195_s16 = sphi %s1253_s16, %s1568_s16   ;;  %s1191_s15 = sphi %s1251_s15, %s1567_s15  }
   0x7   : > { %p97_p0 = scmp.ne.s32.totalorder %s1199_s17, %s1195_s16  ;;  %p98_p1 = scmp.eq.s32.totalorder %s1211_s20, 0 }
   0x8   : > { %p103_p2 = scmp.ne.s32.totalorder %s1195_s16, %s1191_s15  ;;  %p1545_p3 = scmp.eq.s32.totalorder %s1282_s21, 0 }
   0x9   : > { %p1291_p4 = por %p98_p1, %p97_p0  ;;  %p155_p5 = scmp.eq.s32.totalorder %s1282_s21, 1 }
   0xa   : > { %p1298_p6 = por %p1545_p3, %p103_p2  ;;  %p161_p7 = scmp.eq.s32.totalorder %s855_s22, 1 }
   0xb   : > { %p1302_p8 = por %p155_p5, %p97_p0  ;;  %p856_p9 = scmp.ge.s32.totalorder %s1211_s20, 1 }
   0xc   : > { %s1551_s24 = scalar_select %p1298_p6, 1, 0 }
   0xd   : > { %s1552_s25 = scalar_select %p1302_p8, 1, 0 }
   0xe   : > { %p1307_p10 = por %p161_p7, %p103_p2  ;;  %p168_p11 = scmp.lt.s32.totalorder %s1211_s20, 3 }
   0xf   : > { %s1213_s28 = smov [#allocation2]   ;;  %p964_p1 = scmp.lt.s32.totalorder %s1211_s20, 2 }
  0x10   : > { %s1553_s26 = scalar_select %p1307_p10, 1, 0 }
  0x11   : > { %p1312_p12 = pnand %p856_p9, %p168_p11  ;;  %s183_s29 = sshll.u32 %s1213_s28, 4  ;;  %s1316_s29 = int_to_ptr.vmem [resolvable:$true] %s183_s29 }
  0x12   : > { %p1330_p2 = pnand %p964_p1, %p1291_p4  ;;  %s1214_s6 = smov [#allocation5]  }
  0x13   : > { %p947_p13 = pneg %p1312_p12  ;;  %s199_s7 = sshll.u32 %s1214_s6, 4  ;;  %s1334_s7 = int_to_ptr.vmem [resolvable:$true] %s199_s7 }
  0x14   : > { %s1035_s10 = scalar_lea.hbm %s1540_s0, 256 }
  0x15   : > { %p1324_p5 = pnand %p947_p13, %p1545_p3  ;;  %p1036_p7 = scmp.ne.s32.totalorder %s1540_s0, %s1035_s10 }
  0x16   : > { %p1042_p13 = scmp.lt.u32.totalorder %s1035_s10, %s1540_s0 }
  0x17   : > { %p1037_p9 = pneg %p1324_p5 }
  0x19   : > { %p1038_p4 = pnand %p1037_p9, %p1036_p7 }
  0x1b   : > { %p1039_p11 = pneg %p1038_p4 }
  0x1d   : > { %p1044_p1 = pnand %p1042_p13, %p1039_p11 }
  0x1f   : > { %1047 = shalt.err (!%p1044_p1)
}
  0x20   : > { %s1048_s22 = scalar_lea.vmem %s1316_s29, 256  ;;  %p1056_p8 = scmp.lt.s32.totalorder %s1316_s29, %s1316_s29 }
  0x21   : > { %p1049_p0 = scmp.ne.s32.totalorder %s1316_s29, %s1048_s22  ;;  %p1057_p7 = scmp.lt.s32.totalorder %s1048_s22, %s1048_s22 }
  0x23   : > { %p1051_p3 = pnand %p1049_p0, %p1037_p9  ;;  %p1058_p4 = por %p1057_p7, %p1056_p8 }
  0x25   : > { %p1052_p10 = pneg %p1051_p3 }
  0x27   : > { %p1059_p6 = pnand %p1058_p4, %p1052_p10 }
  0x29   : > { %1062 = shalt.err (!%p1059_p6)
}
  0x2a   : > { %s1548_s23 = smov 128   ;;  %s1549_s28 = smov 8  }
  0x2b   : > { %950 = dma.hbm_to_vmem [thread:$0]  (!%p1324_p5), %s1540_s0, 256, %s1316_s29, [#allocation3], %s1548_s23, %s1548_s23, %s1549_s28  }
  0x2c   : > { %s1063_s11 = scalar_lea.hbm %s1541_s1, 256 }
  0x2d   : > { %p1064_p3 = scmp.ne.s32.totalorder %s1541_s1, %s1063_s11  ;;  %p1070_p10 = scmp.lt.u32.totalorder %s1063_s11, %s1541_s1 }
  0x2f   : > { %p1066_p6 = pnand %p1064_p3, %p1037_p9 }
  0x31   : > { %p1067_p8 = pneg %p1066_p6 }
  0x33   : > { %p1072_p0 = pnand %p1070_p10, %p1067_p8 }
  0x35   : > { %1075 = shalt.err (!%p1072_p0)
}
  0x36   : > { %s1076_s29 = scalar_lea.vmem %s1334_s7, 256  ;;  %p1084_p7 = scmp.lt.s32.totalorder %s1334_s7, %s1334_s7 }
  0x37   : > { %p1077_p11 = scmp.ne.s32.totalorder %s1334_s7, %s1076_s29  ;;  %p1085_p4 = scmp.lt.s32.totalorder %s1076_s29, %s1076_s29 }
  0x39   : > { %p1079_p13 = pnand %p1077_p11, %p1037_p9  ;;  %p1086_p3 = por %p1085_p4, %p1084_p7 }
  0x3b   : > { %p1080_p1 = pneg %p1079_p13 }
  0x3d   : > { %p1087_p6 = pnand %p1086_p3, %p1080_p1 }
  0x3f   : > { %1090 = shalt.err (!%p1087_p6)
}
  0x40   : > { %953 = dma.hbm_to_vmem [thread:$0]  (!%p1324_p5), %s1541_s1, 256, %s1334_s7, [#allocation6], %s1548_s23, %s1548_s23, %s1549_s28  }
  0x41   : > { %s90_s9 = sadd.s32 1, %s1199_s17  ;;  %s28_s10 = sadd.s32 1, %s1207_s19 }
  0x42   : > { %s213_s11 = sand.u32 1, %s1211_s20   ;;  %p29_p9 = scmp.ge.s32.totalorder %s28_s10, 2 }
  0x43   : > { %s215_s30 = sand.u32 1, %s1199_s17   ;;  %s881_s12 = sshll.u32 %s1207_s19, 9 }
  0x44   : > { %s1573_s10 = smov (%p29_p9, %s28_s10), 0  ;;  %s860_s13 = sshll.u32 %s215_s30, 5 }
  0x45   : > { %s1404_s29 = scalar_lea.hbm %s1542_s2, %s881_s12  ;;  %s87_s7 = ssub.s32 %s1207_s19, %s1573_s10 }
  0x46   : > { %p88_p5 = scmp.eq.s32.totalorder %s87_s7, 0  ;;  %s217_s6 = scalar_lea.vmem [#allocation7], %s860_s13 }
  0x47   : > { %s224_s8 = sshll.u32 %s217_s6, 4  ;;  %s1413_s28 = scalar_lea.sflag [#allocation3], %s213_s11  ;;  %s1408_s8 = int_to_ptr.vmem [resolvable:$true] %s224_s8 }
  0x48   : > { %s1411_s23 = scalar_select %p88_p5, %s1199_s17, %s90_s9  }
  0x49   : > { %s1091_s30 = scalar_lea.hbm %s1404_s29, 512  ;;  %p1093_p10 = pneg %p1330_p2 }
  0x4a   : > { %p1092_p8 = scmp.ne.s32.totalorder %s1404_s29, %s1091_s30  ;;  %s1096_s22 = scalar_lea.hbm %s1542_s2, 1024 }
  0x4b   : > { %p1097_p13 = scmp.lt.u32.totalorder %s1404_s29, %s1542_s2  ;;  %p1098_p1 = scmp.lt.u32.totalorder %s1096_s22, %s1091_s30 }
  0x4c   : > { %p1094_p0 = pnand %p1093_p10, %p1092_p8  ;;  %p1100_p4 = scmp.lt.u32.totalorder %s1091_s30, %s1404_s29 }
  0x4d   : > { %p1099_p7 = por %p1098_p1, %p1097_p13 }
  0x4e   : > { %p1095_p11 = pneg %p1094_p0 }
  0x4f   : > { %p1101_p3 = por %p1100_p4, %p1099_p7 }
  0x51   : > { %p1102_p6 = pnand %p1101_p3, %p1095_p11 }
  0x53   : > { %1105 = shalt.err (!%p1102_p6)
}
  0x54   : > { %s1106_s9 = scalar_lea.vmem %s1408_s8, 512  ;;  %s1217_s11 = smov [#allocation7]  }
  0x55   : > { %p1107_p9 = scmp.ne.s32.totalorder %s1408_s8, %s1106_s9  ;;  %s1111_s6 = sshll.u32 %s1217_s11, 4  ;;  %s1112_s6 = int_to_ptr.vmem [resolvable:$false] %s1111_s6 }
  0x56   : > { %s1113_s12 = scalar_lea.vmem %s1112_s6, 1024  ;;  %p1114_p0 = scmp.lt.s32.totalorder %s1408_s8, %s1112_s6 }
  0x57   : > { %p1109_p5 = pnand %p1107_p9, %p1093_p10  ;;  %p1115_p13 = scmp.lt.s32.totalorder %s1113_s12, %s1106_s9 }
  0x59   : > { %p1110_p8 = pneg %p1109_p5  ;;  %p1116_p1 = por %p1115_p13, %p1114_p0 }
  0x5b   : > { %p1117_p7 = pnand %p1116_p1, %p1110_p8 }
  0x5d   : > { %1120 = shalt.err (!%p1117_p7)
}
  0x5e   : > { %s1557_s30 = smov 8   ;;  %s1558_s14 = smov 128  }
  0x5f   : > { %957 = dma.hbm_to_vmem [thread:$0]  (!%p1330_p2), %s1404_s29, 512, %s1408_s8, %s1413_s28, %s1558_s14, %s1558_s14, %s1557_s30  }
  0x60   : > { %242 = sbr.rel (%p1312_p12) target bundleno = 1216 (0x4c0), region = 36  ;;  %p1559_p10 = scmp.eq.s32.totalorder (!%p1312_p12), %s1282_s21, 0 }
  0x67   : > { %1174 = dma.done.wait (%p1559_p10), [#allocation3], 256   ;;  %p1560_p11 = pmov %p1559_p10 }
  0x68   : > { %p1561_p4 = pmov %p1559_p10 }
  0x69   : > { %1176 = vsyncadd (%p1560_p11), [#allocation3], 4294967040 }
  0x6a   : > { %1178 = dma.done.wait (%p1561_p4), [#allocation6], 256   ;;  %p1562_p3 = pmov %p1561_p4 }
  0x6b   : > { %s252_s5 = sand.u32 1, %s1282_s21   ;;  %s1456_s28 = sand.u32 1, %s1195_s16  }
  0x6c   : > { %1180 = vsyncadd (%p1562_p3), [#allocation6], 4294967040  ;;  %s866_s27 = sshll.u32 %s1456_s28, 5  ;;  %s253_s29 = scalar_lea.sflag [#allocation3], %s252_s5 }
  0x6d   : > { %s256_s8 = scalar_lea.vmem [#allocation7], %s866_s27  ;;  %p1563_p12 = scmp.ne.s32.totalorder %s1551_s24, 0 }
  0x6f   : > { %1182 = dma.done.wait (%p1563_p12), %s253_s29, 512  }
  0x70   : > { %1184 = vsyncadd (%p1563_p12), %s253_s29, 4294966784  ;;  %vm303_vm0 = vcmask 261120   ;;  %v292_v0 = vld [vmem:[%s256_s8] sm:$0xff]  ;;  %v293_v1 = vld [vmem:[%s256_s8 + $0x8] sm:$0xff]  ;;  %v1218_v8 = vmov 0.0   ;;  %p286_p2 = scmp.lt.s32.totalorder %s1203_s18, 1 }
  0x71   : > { %v294_v2 = vld [vmem:[%s256_s8 + $0x10] sm:$0xff]  ;;  %v927_v3 = vpack.c.bf16 %v293_v1, %v292_v0  ;;  %v295_v4 = vld [vmem:[%s256_s8 + $0x18] sm:$0xff]  ;;  %v290_v5 = vld [vmem:[#allocation2] sm:$0xff]  ;;  %907 = vmatprep.subr.mxu1 %v1218_v8  ;;  %vm1219_vm1 = vmmov 0   ;;  %s1220_s7 = smov 112   ;;  %vm394_vm2 = vcmask 130048  }
  0x72   : > { %v931_v6 = vpack.c.bf16 %v295_v4, %v294_v2  ;;  %904 = vmatprep.mubr.msk.f32.mxu0 %vm303_vm0, %v290_v5  ;;  %v291_v7 = vld [vmem:[#allocation2 + $0x8] sm:$0xff]  ;;  %s287_s21 = scalar_select %p286_p2, %s1203_s18, 1  ;;  %909 = vmatprep.mubr.msk.f32.mxu1 %vm1219_vm1, %v1218_v8  ;;  %v385_v16 = vld [vmem:[#allocation5] sm:$0xff]  ;;  %v386_v18 = vld [vmem:[#allocation5 + $0x8] sm:$0xff]  ;;  %vm546_vm3 = vcmask 64512  }
  0x73   : > { %928 = vmatprep.subr.bf16.mxu0 %v927_v3  ;;  %v387_v17 = vsub.f32 1.0, %v385_v16  ;;  %v388_v20 = vsub.f32 1.0, %v386_v18  ;;  %s1221_s9 = smov 96   ;;  %s867_s11 = sshll.u32 %s1456_s28, 4 }
  0x74   : > { %930 = vmatpush3.bf16.msra.mxu0 %v927_v3  ;;  %s288_s13 = scalar_lea.vmem %s1543_s3, %s287_s21  ;;  %s283_s6 = scalar_lea.vmem [#allocation8], %s867_s11 }
  0x75   : > { %932 = vmatprep.subr.bf16.mxu0 %v931_v6  ;;  %v868_v9 = vld [vmem:[%s288_s13] ss:$0 sm:$0xff]  ;;  %v389_v19 = vmul.f32 -10000.0, %v387_v17  ;;  %v390_v24 = vmul.f32 -10000.0, %v388_v20  ;;  %s739_s12 = sshll.u32 %s283_s6, 4  ;;  %s878_s30 = sshll.u32 %s1203_s18, 7  ;;  %s1485_s12 = int_to_ptr.vmem [resolvable:$true] %s739_s12 }
  0x76   : > { %s1490_s27 = scalar_lea.hbm %s1544_s4, %s878_s30  ;;  %s724_s29 = scalar_lea.sflag [#allocation4], %s1456_s28 }
  0x77   : > { %s1121_s18 = scalar_lea.vmem %s1485_s12, 256  ;;  %p1564_p9 = scmp.ne.s32.totalorder %s1552_s25, 0 }
  0x78   : > { %934 = vmatpush3.bf16.msra.mxu0 %v931_v6  ;;  %p1122_p6 = scmp.ne.s32.totalorder %s1485_s12, %s1121_s18  ;;  %s1222_s8 = smov [#allocation8]  }
  0x79   : > { %917 = vmatprep.subr.mxu0 %v1218_v8  ;;  %s1125_s21 = sshll.u32 %s1222_s8, 4  ;;  %s1126_s21 = int_to_ptr.vmem [resolvable:$false] %s1125_s21 }
  0x7a   : > { %p1123_p5 = pnand %p1122_p6, %p1564_p9  ;;  %s1127_s24 = scalar_lea.vmem %s1126_s21, 512 }
  0x7b   : > { %905 = vmatmul.mubr.msk.f32.vlgmr.msra.gmra.mrb[0].mxu0 %vm303_vm0, %v291_v7  ;;  %p1128_p0 = scmp.lt.s32.totalorder %s1485_s12, %s1126_s21  ;;  %p1129_p13 = scmp.lt.s32.totalorder %s1127_s24, %s1121_s18 }
  0x7c   : > { %919 = vmatprep.mubr.msk.f32.mxu0 %vm1219_vm1, %v1218_v8  ;;  %p1124_p8 = pneg %p1123_p5 }
  0x7d   : > { %p1130_p1 = por %p1129_p13, %p1128_p0 }
  0x7f   : > { %p1131_p7 = pnand %p1130_p1, %p1124_p8 }
 0x14e   : > { %v906_v10 = vpop.f32.mrb[0].mxu0 }
 0x14f   : > { %v376_v11 = vpop.f32.mrb[1].mxu0  ;;  %v382_v13 = vadd.f32 %v906_v10, %v868_v9 }
 0x150   : > { %v377_v12 = vadd.f32 %v868_v9, %v376_v11 }
 0x152   : > { %392 = vrot.lane.b32.xlu0 %v377_v12, %s1220_s7 }
 0x156   : > { %470 = vrot.lane.b32.xlu0 %v382_v13, %s1220_s7 }
 0x1c4   : > { %v393_v14 = vpop.permute.xlu0 %392 }
 0x1c5   : > { %908 = vmatpush3.xpose.msk.msra.mxu1 %vm394_vm2, %v393_v14 }
 0x1c6   : > { %912 = vmatprep.subr.mxu1 %v1218_v8 }
 0x1c8   : > { %910 = vmatmul.mubr.msk.f32.vlgmr.msra.gmra.mrb[0].mxu1 %vm394_vm2, %v377_v12  ;;  %v471_v15 = vpop.permute.xlu0 %470 }
 0x1c9   : > { %913 = vmatpush3.xpose.msk.msra.mxu1 %vm394_vm2, %v471_v15  ;;  %914 = vmatprep.mubr.msk.f32.mxu1 %vm1219_vm1, %v1218_v8 }
 0x1ca   : > { %922 = vmatprep.subr.mxu1 %v1218_v8 }
 0x1cc   : > { %915 = vmatmul.mubr.msk.f32.vlgmr.msra.gmra.mrb[2].mxu1 %vm394_vm2, %v382_v13 }
 0x1cd   : > { %924 = vmatprep.mubr.msk.f32.mxu1 %vm1219_vm1, %v1218_v8 }
 0x29b   : > { %v465_v21 = vpop.f32.mrb[0].mxu1 }
 0x29c   : > { %v466_v22 = vadd.f32 %v465_v21, %v389_v19  ;;  %v911_v23 = vpop.f32.mrb[1].mxu1 }
 0x29e   : > { %v547_v25 = vsel %vm546_vm3, %v466_v22, -inf }
 0x29f   : > { %548 = vmax.xlane.f32.xlu1 %v547_v25  ;;  %v542_v26 = vpop.f32.mrb[2].mxu1 }
 0x2a0   : > { %v543_v27 = vadd.f32 %v542_v26, %v390_v24  ;;  %v916_v28 = vpop.f32.mrb[3].mxu1 }
 0x2a2   : > { %v550_v29 = vsel %vm546_vm3, %v543_v27, -inf }
 0x2a3   : > { %551 = vmax.xlane.f32.xlu1 %v550_v29 }
 0x2b4   : > { %569 = vrot.lane.b32.xlu1 %v377_v12, %s1221_s9 }
 0x32c   : > { %v549_v30 = vpop.xlane.xlu1 %548 }
 0x32d   : > { %v553_v31 = vsub.f32 %v466_v22, %v549_v30 }
 0x32f   : > { %v555_v32 = vmul.f32 1.442695, %v553_v31 }
 0x330   : > { %v552_v33 = vpop.xlane.xlu1 %551 }
 0x331   : > { %1027 = vpow2.f32 %v555_v32  ;;  %v554_v34 = vsub.f32 %v543_v27, %v552_v33 }
 0x333   : > { %v557_v35 = vmul.f32 1.442695, %v554_v34 }
 0x334   : > { %v570_v36 = vpop.permute.xlu1 %569 }
 0x335   : > { %1029 = vpow2.f32 %v557_v35  ;;  %918 = vmatpush3.msra.mxu0 %v570_v36 }
 0x33b   : > { %v1028_v37 = vpop.eup %1027 }
 0x33c   : > { %v559_v38 = vsel %vm546_vm3, %v1028_v37, 0.0 }
 0x33d   : > { %560 = vadd.xlane.f32.xlu0 %v559_v38 }
 0x33f   : > { %v1030_v39 = vpop.eup %1029 }
 0x340   : > { %v562_v40 = vsel %vm546_vm3, %v1030_v39, 0.0 }
 0x341   : > { %563 = vadd.xlane.f32.xlu1 %v562_v40 }
 0x352   : > { %645 = vrot.lane.b32.xlu1 %v382_v13, %s1221_s9 }
 0x3ca   : > { %v561_v41 = vpop.xlane.xlu0 %560 }
 0x3cb   : > { %1031 = vrcp.f32 %v561_v41 }
 0x3ce   : > { %v564_v42 = vpop.xlane.xlu1 %563 }
 0x3cf   : > { %1033 = vrcp.f32 %v564_v42 }
 0x3d2   : > { %v646_v43 = vpop.permute.xlu1 %645 }
 0x3d3   : > { %923 = vmatpush3.msra.mxu1 %v646_v43 }
 0x3d5   : > { %v1032_v44 = vpop.eup %1031 }
 0x3d6   : > { %v567_v45 = vmul.f32 %v1032_v44, %v1028_v37 }
 0x3d8   : > { %920 = vmatmul.mubr.msk.f32.vlgmr.msra.gmra.mrb[2].mxu0 %vm546_vm3, %v567_v45 }
 0x3d9   : > { %v1034_v46 = vpop.eup %1033 }
 0x3da   : > { %v568_v47 = vmul.f32 %v1034_v46, %v1030_v39 }
 0x3dc   : > { %925 = vmatmul.mubr.msk.f32.vlgmr.msra.gmra.mrb[4].mxu1 %vm546_vm3, %v568_v47 }
 0x4ab   : > { %v641_v48 = vpop.f32.mrb[2].mxu0 }
 0x4ac   : > { %721 = vst.msk [vmem:[%s283_s6] sm:$0xff] %vm394_vm2, %v641_v48  ;;  %v921_v49 = vpop.f32.mrb[3].mxu0 }
 0x4af   : > { %v717_v50 = vpop.f32.mrb[4].mxu1 }
 0x4b0   : > { %722 = vst.msk [vmem:[%s283_s6 + $0x8] sm:$0xff] %vm394_vm2, %v717_v50  ;;  %v926_v51 = vpop.f32.mrb[5].mxu1 }
 0x4b1   : > { %1134 = shalt.err (!%p1131_p7)
}
 0x4b2   : > { %s1135_s22 = scalar_lea.hbm %s1490_s27, 256  ;;  %s1139_s9 = scalar_lea.hbm %s1544_s4, 512 }
 0x4b3   : > { %p1136_p10 = scmp.ne.s32.totalorder %s1490_s27, %s1135_s22  ;;  %p1140_p3 = scmp.lt.u32.totalorder %s1490_s27, %s1544_s4 }
 0x4b4   : > { %p1141_p12 = scmp.lt.u32.totalorder %s1139_s9, %s1135_s22  ;;  %p1143_p6 = scmp.lt.u32.totalorder %s1135_s22, %s1490_s27 }
 0x4b5   : > { %p1137_p11 = pnand %p1136_p10, %p1564_p9 }
 0x4b6   : > { %p1142_p2 = por %p1141_p12, %p1140_p3 }
 0x4b7   : > { %p1138_p4 = pneg %p1137_p11 }
 0x4b8   : > { %p1144_p5 = por %p1143_p6, %p1142_p2 }
 0x4ba   : > { %p1145_p8 = pnand %p1144_p5, %p1138_p4 }
 0x4bc   : > { %1148 = shalt.err (!%p1145_p8)
}
 0x4bd   : > { %s1223_s30 = smov 128   ;;  %s1224_s14 = smov 256  }
 0x4be   : > { %s1225_s5 = smov 8  }
 0x4bf   : > { %945 = dma.vmem_to_hbm [thread:$0]  (%p1564_p9), %s1485_s12, 256, %s1490_s27, %s724_s29, %s1223_s30, %s1224_s14, %s1225_s5  }
 0x4c0 PF: > { %s754_s18 = sand.u32 1, %s1191_s15   ;;  %p1565_p0 = scmp.ne.s32.totalorder %s1553_s26, 0 }
 0x4c1   : > { %p1566_p13 = scmp.ge.s32.totalorder %s1211_s20, 2  ;;  %s755_s8 = scalar_lea.sflag [#allocation4], %s754_s18 }
 0x4c3   : > { %p959_p1 = pnand %p1566_p13, %p1565_p0 }
 0x4c5   : > { %1186 = dma.done.wait (!%p959_p1), %s755_s8, 256  }
 0x4c6   : > { %1188 = vsyncadd (!%p959_p1), %s755_s8, 4294967040  ;;  %s19_s20 = sadd.s32 1, %s1211_s20   ;;  %s1567_s15 = smov %s1195_s16 }
 0x4c7   : > { %p16_p7 = scmp.ge.s32.totalorder %s19_s20, 4   ;;  %s1568_s16 = smov %s1199_s17 }
 0x4c8   : > { %s1569_s17 = smov %s1411_s23  ;;  %s1570_s18 = smov %s1207_s19 }
 0x4c9   : > { %s1571_s19 = smov %s1573_s10  ;;  %18 = sbr.rel (!%p16_p7) target bundleno = 6 (0x6), region = 93 }
 0x4d0   :  { %760 = vsyncpa [#allocation3], 1 }
 0x4d1   :  { %762 = vsyncpa [#allocation3 + $0x1], 1 }
 0x4d2   :  { %763 = vsyncpa [#allocation6], 1 }
 0x4d3   :  { %764 = vsyncpa [#allocation4], 1 }
 0x4d4   :  { %766 = vsyncpa [#allocation4 + $0x1], 1 }

</bundles_post_ra>
